<compile_context>
chip_gen: v7x
topology: tpu7x:2x2x1
jax: 0.10.0
libtpu: 0.0.40
codegen_flags: <defaults>
</compile_context>

<pallas_src>
import functools

import jax
import jax.numpy as jnp
from jax.experimental import pallas as pl
from jax.experimental.pallas import tpu as pltpu


def _hpe_kernel(x_ref, w_ref, b_ref, o_ref):
    # x_ref: (3, tm)   channels-first xyz tile (lane-dense along fused N*k)
    # w_ref: (C, 3)    folded weight  w2 @ w1      (dtype matches x; bf16 stays bf16)
    # b_ref: (C, 1)    folded bias    w2 @ b1 + b2 (kept f32, added to f32 accumulator)
    # o_ref: (C, tm)   lane-dense output tile
    out = jnp.dot(w_ref[...], x_ref[...], preferred_element_type=jnp.float32)
    out = out + b_ref[...]  # (C,1)->(C,tm) broadcast-add; VALU work hidden under HBM DMA
    o_ref[...] = out.astype(o_ref.dtype)


def _round_up(x, m):
    return ((x + m - 1) // m) * m


@functools.partial(jax.jit, static_argnames=("tm",))
def hpe_forward(xyz, w1, b1, w2, b2, *, tm=None):
    """xyz: [B, 3, N, k] -> [B, C, N, k].

    Weights are PyTorch-native 1x1-conv layout:
      w1: [C//4, 3], b1: [C//4], w2: [C, C//4], b2: [C]
    tm: optional lane-tile override (multiple of 128); default is auto-sized
        from a generation-safe VMEM budget.
    """
    B, three, N, k = xyz.shape
    assert three == 3
    C4 = w1.shape[0]
    C = w2.shape[0]

    # Fold the two affine 1x1 convs into one affine map.  Only valid because
    # norm_args=None and act_args=None (nothing between / after the convs).
    w_f32 = w2.astype(jnp.float32) @ w1.astype(jnp.float32)                   # [C, 3]
    b_f = (w2.astype(jnp.float32) @ b1.astype(jnp.float32).reshape(C4, 1)
           + b2.astype(jnp.float32).reshape(C, 1))                            # [C, 1]
    # Keep the matmul in the input's native dtype (bf16 is MXU-native on
    # v5e/v6e/v7x) -> no in-kernel up-cast pass over the x tile.
    w_f = w_f32.astype(xyz.dtype) if xyz.dtype == jnp.bfloat16 else w_f32

    Nk = N * k
    itemsize = jnp.dtype(xyz.dtype).itemsize

    # --- tile-size selection (generation-safe) --------------------------------
    # The double-buffered in/out tiles must fit VMEM on every TPU generation
    # (v7x has only 64 MiB); budget ~24 MiB for them and leave headroom.
    if tm is None:
        budget = 24 << 20
        per_lane = 2 * (3 + C) * itemsize            # double-buffered bytes per lane
        tm_cap = max(128, min(32768, (budget // per_lane) // 128 * 128))
    else:
        assert tm % 128 == 0
        tm_cap = tm

    # Balanced split: tail waste < 128 lanes (not up to tm-1).
    num_tiles = pl.cdiv(Nk, tm_cap)
    # Keep >= 2 total grid steps so both v7x TensorCores get work.
    if B * num_tiles < 2 and Nk > 128:
        num_tiles = 2
    tm_eff = min(tm_cap, _round_up(pl.cdiv(Nk, num_tiles), 128))
    grid_n = pl.cdiv(Nk, tm_eff)

    # No HBM pad / slice: Pallas masks the ragged last tile itself.
    x = xyz.reshape(B, 3, Nk)  # free reshape, no transpose / copy

    # VMEM: double-buffered in/out tiles + tiny resident folded weights.
    tile_bytes = 2 * (3 + C) * tm_eff * itemsize + 2 * (3 * C * itemsize + C * 4)
    vmem_limit = int(min(max(int(1.5 * tile_bytes), 8 << 20), 48 << 20))

    cost = pl.CostEstimate(
        flops=2 * B * Nk * 3 * C + B * Nk * C,
        transcendentals=0,
        bytes_accessed=B * Nk * (3 + C) * itemsize + 3 * C * itemsize + C * 4,
    )

    out3 = pl.pallas_call(
        _hpe_kernel,
        out_shape=jax.ShapeDtypeStruct((B, C, Nk), xyz.dtype),
        grid_spec=pltpu.PrefetchScalarGridSpec(
            num_scalar_prefetch=0,
            grid=(B, grid_n),
            in_specs=[
                pl.BlockSpec((pl.Squeezed(), 3, tm_eff), lambda b, i: (b, 0, i)),
                pl.BlockSpec((C, 3), lambda b, i: (0, 0)),   # folded weight (resident)
                pl.BlockSpec((C, 1), lambda b, i: (0, 0)),   # folded bias   (resident)
            ],
            out_specs=pl.BlockSpec((pl.Squeezed(), C, tm_eff), lambda b, i: (b, 0, i)),
        ),
        compiler_params=pltpu.CompilerParams(
            dimension_semantics=("parallel", "parallel"),
            vmem_limit_bytes=vmem_limit,
        ),
        cost_estimate=cost,
    )(x, w_f, b_f)

    return out3.reshape(B, C, N, k)


def _reference(xyz, w1, b1, w2, b2):
    # Pure-JAX reference of the two un-folded 1x1 convs (NCHW semantics).
    xf = xyz.astype(jnp.float32)
    h = jnp.einsum("oc,bcnk->bonk", w1.astype(jnp.float32), xf) \
        + b1.astype(jnp.float32)[None, :, None, None]
    o = jnp.einsum("oc,bcnk->bonk", w2.astype(jnp.float32), h) \
        + b2.astype(jnp.float32)[None, :, None, None]
    return o.astype(xyz.dtype)


if __name__ == "__main__":
    # Small shapes consistent with the module: B=2, in_channels C=32, N=16, k=8.
    B, C, N, k = 2, 32, 16, 8
    C4 = C // 4

    key = jax.random.PRNGKey(0)
    k_xyz, k_w1, k_b1, k_w2, k_b2 = jax.random.split(key, 5)

    xyz = jax.random.normal(k_xyz, (B, 3, N, k), dtype=jnp.float32)

    # PyTorch-native 1x1-conv parameter layout: [C_out, C_in] (+ bias [C_out]).
    w1 = jax.random.uniform(k_w1, (C4, 3), dtype=jnp.float32, minval=-0.5, maxval=0.5)
    b1 = jax.random.uniform(k_b1, (C4,), dtype=jnp.float32, minval=-0.5, maxval=0.5)
    w2 = jax.random.uniform(k_w2, (C, C4), dtype=jnp.float32, minval=-0.3, maxval=0.3)
    b2 = jax.random.uniform(k_b2, (C,), dtype=jnp.float32, minval=-0.3, maxval=0.3)

    out = jax.block_until_ready(hpe_forward(xyz, w1, b1, w2, b2))
    ref = _reference(xyz, w1, b1, w2, b2)
    assert out.shape == (B, C, N, k), out.shape
    assert jnp.allclose(out, ref, atol=1e-4, rtol=1e-4), "mismatch vs reference"

    # Ragged fused axis (N*k not a multiple of 128): exercises the masked
    # last-tile path now that the wrapper pad/slice have been removed.
    N2, k2 = 17, 9
    xyz2 = jax.random.normal(k_xyz, (B, 3, N2, k2), dtype=jnp.float32)
    out2 = jax.block_until_ready(hpe_forward(xyz2, w1, b1, w2, b2))
    ref2 = _reference(xyz2, w1, b1, w2, b2)
    assert out2.shape == (B, C, N2, k2), out2.shape
    assert jnp.allclose(out2, ref2, atol=1e-4, rtol=1e-4), "mismatch vs reference (ragged)"

    # TODO(synk): mode=2 and mode=4 (sin/cos positional embedding + conv) branches
    # are not implemented; the default mode=1 path is what this kernel reproduces.
    print("KERNEL_OK")
</pallas_src>

<mosaic_0001>
module attributes {stable_mosaic.version = 11 : i64} {
  func.func @_hpe_kernel(%arg0: i32, %arg1: i32, %arg2: memref<1x3x128xf32, #tpu.memory_space<vmem>>, %arg3: memref<32x3xf32, #tpu.memory_space<vmem>>, %arg4: memref<32x1xf32, #tpu.memory_space<vmem>>, %arg5: memref<1x32x128xf32, #tpu.memory_space<vmem>>) attributes {dimension_semantics = [#tpu.dimension_semantics<parallel>, #tpu.dimension_semantics<parallel>], iteration_bounds = array<i64: 2, 1>, scalar_prefetch = 0 : i64, scratch_operands = 0 : i64, tpu.core_type = #tpu.core_type<tc>, window_params = [{transform_indices = @transform_0, window_bounds = array<i64: 1, 3, 128>}, {pipeline_mode = #tpu.pipeline_mode<synchronous>, transform_indices = @transform_1, window_bounds = array<i64: 32, 3>}, {pipeline_mode = #tpu.pipeline_mode<synchronous>, transform_indices = @transform_2, window_bounds = array<i64: 32, 1>}, {transform_indices = @transform_3, window_bounds = array<i64: 1, 32, 128>}]} {
    %c0 = arith.constant 0 : index
    %c0_0 = arith.constant 0 : index
    %0 = vector.load %arg3[%c0, %c0_0] : memref<32x3xf32, #tpu.memory_space<vmem>>, vector<32x3xf32>
    %c0_1 = arith.constant 0 : index
    %c0_2 = arith.constant 0 : index
    %c0_3 = arith.constant 0 : index
    %1 = vector.load %arg2[%c0_1, %c0_2, %c0_3] : memref<1x3x128xf32, #tpu.memory_space<vmem>>, vector<1x3x128xf32>
    %2 = vector.shape_cast %1 : vector<1x3x128xf32> to vector<3x128xf32>
    %cst = arith.constant dense<0.000000e+00> : vector<32x128xf32>
    %3 = tpu.matmul %0, %2, %cst {dimension_numbers = #tpu.dot_dimension_numbers<[1], [0], [0], [1], [0, 0, 1, 1], [], []>} : vector<32x3xf32>, vector<3x128xf32>, vector<32x128xf32> -> vector<32x128xf32>
    %c0_4 = arith.constant 0 : index
    %c0_5 = arith.constant 0 : index
    %4 = vector.load %arg4[%c0_4, %c0_5] : memref<32x1xf32, #tpu.memory_space<vmem>>, vector<32x1xf32>
    %5 = vector.broadcast %4 : vector<32x1xf32> to vector<32x128xf32>
    %6 = arith.addf %3, %5 : vector<32x128xf32>
    %c0_6 = arith.constant 0 : index
    %c0_7 = arith.constant 0 : index
    %c0_8 = arith.constant 0 : index
    %7 = vector.load %arg5[%c0_6, %c0_7, %c0_8] : memref<1x32x128xf32, #tpu.memory_space<vmem>>, vector<1x32x128xf32>
    %8 = vector.shape_cast %7 : vector<1x32x128xf32> to vector<32x128xf32>
    %9 = vector.shape_cast %6 : vector<32x128xf32> to vector<1x32x128xf32>
    tpu.vector_store %arg5[%c0_6, %c0_7, %c0_8], %9 {strides = array<i32>} : memref<1x32x128xf32, #tpu.memory_space<vmem>>, vector<1x32x128xf32>,
    return
  }
  func.func @transform_0(%arg0: i32, %arg1: i32) -> (i32, i32, i32) {
    %c0_i32 = arith.constant 0 : i32
    %c0_i32_0 = arith.constant 0 : i32
    return %arg0, %c0_i32, %arg1 : i32, i32, i32
  }
  func.func @transform_1(%arg0: i32, %arg1: i32) -> (i32, i32) {
    %c0_i32 = arith.constant 0 : i32
    %c0_i32_0 = arith.constant 0 : i32
    %c0_i32_1 = arith.constant 0 : i32
    return %c0_i32, %c0_i32_0 : i32, i32
  }
  func.func @transform_2(%arg0: i32, %arg1: i32) -> (i32, i32) {
    %c0_i32 = arith.constant 0 : i32
    %c0_i32_0 = arith.constant 0 : i32
    %c0_i32_1 = arith.constant 0 : i32
    return %c0_i32, %c0_i32_0 : i32, i32
  }
  func.func @transform_3(%arg0: i32, %arg1: i32) -> (i32, i32, i32) {
    %c0_i32 = arith.constant 0 : i32
    %c0_i32_0 = arith.constant 0 : i32
    return %arg0, %c0_i32, %arg1 : i32, i32, i32
  }
}

</mosaic_0001>

<bundles_post_ra>
// kernel: hpe_forward.1
= control target key start
LH: loop header
LB: loop body
LE: loop exit
PB: predicated region body
PF: predicated region fallthrough
CT: control target
= control target key end

     0   :  { %s517_s12 = smov 0   ;;  %s519_s13 = smov 0   ;;  %s578_s0 = inlined_call_operand.vmem [shape: f32[2,3,128], index: 0, kind: input, shape index: {}]   ;;  %s579_s1 = inlined_call_operand.vmem [shape: f32[32,3], index: 1, kind: input, shape index: {}]   ;;  %s580_s2 = inlined_call_operand.vmem [shape: f32[32,1], index: 2, kind: input, shape index: {}]   ;;  %s581_s3 = inlined_call_operand.vmem [shape: f32[2,32,128], index: 3, kind: output, shape index: {}]  }
   0x1   :  { %s521_s14 = smov 0  }
   0x2 LB: > { %s25_s15 = sadd.s32 1, %s490_s13  ;;  %p418_p0 = scmp.ge.s32.totalorder %s494_s14, 1  ;;  %s494_s14 = sphi %s521_s14, %s13_s14   ;;  %s490_s13 = sphi %s519_s13, %s583_s13   ;;  %s486_s12 = sphi %s517_s12, %s582_s12  }
   0x3   : > { %p27_p1 = scmp.ge.s32.totalorder %s25_s15, 2  ;;  %p155_p2 = scmp.lt.s32.totalorder %s494_s14, 3 }
   0x5   : > { %s585_s15 = smov (%p27_p1, %s25_s15), 0  ;;  %p156_p3 = pnand %p418_p0, %p155_p2 }
   0x6   : > { %p184_p4 = scmp.lt.s32.totalorder (!%p156_p3), %s486_s12, 1  ;;  %v199_v0 = vld [vmem:[%s579_s1] sm:$0xff] (!%p156_p3)  ;;  %vm228_vm0 = vcmask (!%p156_p3), 23552   ;;  %v201_v1 = vld [vmem:[%s579_s1 + $0x10] sm:$0xff] (!%p156_p3)  ;;  %v496_v4 = vmov (!%p156_p3), 0   ;;  %vm241_vm1 = vcmask (!%p156_p3), 1042432  }
   0x7   : > { %159 = sbr.rel (%p156_p3) target bundleno = 236 (0xec), region = 32  ;;  %437 = vmatprep.mubr.msk.f32.mxu0 (!%p156_p3), %vm228_vm0, %v199_v0  ;;  %440 = vmatprep.mubr.msk.f32.mxu1 (!%p156_p3), %vm228_vm0, %v201_v1  ;;  %v206_v2 = vld [vmem:[%s580_s2 + $0x10] sm:$0xff] (!%p156_p3)  ;;  %v204_v3 = vld [vmem:[%s580_s2] sm:$0xff] (!%p156_p3)  ;;  %v200_v6 = vld [vmem:[%s579_s1 + $0x8] sm:$0xff] (!%p156_p3) }
   0x8   : > { %471 = vset.pattern.permute.xlu1 (!%p156_p3), %v496_v4  ;;  %470 = vset.pattern.permute.xlu0 (!%p156_p3), %v496_v4  ;;  %v202_v7 = vld [vmem:[%s579_s1 + $0x18] sm:$0xff] (!%p156_p3)  ;;  %v205_v9 = vld [vmem:[%s580_s2 + $0x8] sm:$0xff] (!%p156_p3) }
   0x9   : > { %220 = vperm.xlu1 (!%p156_p3), %471, %v206_v2   ;;  %210 = vperm.xlu0 (!%p156_p3), %470, %v204_v3   ;;  %v207_v8 = vld [vmem:[%s580_s2 + $0x18] sm:$0xff] (!%p156_p3) }
   0xd   : > { %225 = vperm.xlu1 (!%p156_p3), %471, %v207_v8   ;;  %215 = vperm.xlu0 (!%p156_p3), %470, %v205_v9  }
   0xe   : > { %s587_s12 = smov (!%p184_p4, %s486_s12), 1 }
   0xf   : > { %s419_s24 = sshll.u32 %s587_s12, 2  ;;  %s429_s9 = sshll.u32 %s587_s12, 5 }
  0x10   : > { %s190_s27 = scalar_lea.vmem %s578_s0, %s419_s24  ;;  %s198_s16 = scalar_lea.vmem %s581_s3, %s429_s9 }
  0x11   : > { %v203_v5 = vld [vmem:[%s190_s27] sm:$0x7] }
  0x12   : > { %435 = vmatprep.subr.msk.mxu0 %vm241_vm1, %v203_v5  ;;  %443 = vmatprep.subr.msk.mxu1 %vm241_vm1, %v203_v5 }
  0x13   : > { %436 = vmatpush3.msk.msra.mxu0 %vm241_vm1, %v203_v5  ;;  %444 = vmatpush3.msk.msra.mxu1 %vm241_vm1, %v203_v5 }
  0x14   : > { %438 = vmatmul.mubr.msk.f32.vlgmr.msra.gmra.mrb[0].mxu0 %vm228_vm0, %v200_v6  ;;  %441 = vmatmul.mubr.msk.f32.vlgmr.msra.gmra.mrb[0].mxu1 %vm228_vm0, %v202_v7 }
  0x88   : > { %v221_v10 = vpop.permute.xlu1 %220  ;;  %v211_v11 = vpop.permute.xlu0 %210 }
  0x8c   : > { %v226_v12 = vpop.permute.xlu1 %225  ;;  %v216_v13 = vpop.permute.xlu0 %215 }
  0xe7   : > { %v439_v14 = vpop.f32.mrb[0].mxu0  ;;  %v442_v15 = vpop.f32.mrb[0].mxu1 }
  0xe8   : > { %v317_v16 = vadd.f32 %v439_v14, %v216_v13  ;;  %v327_v17 = vadd.f32 %v442_v15, %v226_v12  ;;  %v311_v18 = vpop.f32.mrb[1].mxu0  ;;  %v321_v19 = vpop.f32.mrb[1].mxu1 }
  0xe9   : > { %v312_v20 = vadd.f32 %v311_v18, %v211_v11  ;;  %v322_v21 = vadd.f32 %v321_v19, %v221_v10 }
  0xea   : > { %331 = vst [vmem:[%s198_s16 + $0x8] sm:$0xff] %v317_v16  ;;  %333 = vst [vmem:[%s198_s16 + $0x18] sm:$0xff] %v327_v17 }
  0xeb   : > { %330 = vst [vmem:[%s198_s16] sm:$0xff] %v312_v20  ;;  %332 = vst [vmem:[%s198_s16 + $0x10] sm:$0xff] %v322_v21 }
  0xec PF: > { %s13_s14 = sadd.s32 1, %s494_s14   ;;  %s582_s12 = smov %s490_s13 }
  0xed   : > { %p10_p5 = scmp.ge.s32.totalorder %s13_s14, 4   ;;  %s583_s13 = smov %s585_s15 }
  0xef   :  { %12 = sbr.rel (!%p10_p5) target bundleno = 2 (0x2), region = 62 }

</bundles_post_ra>
